<compile_context>
chip_gen: v7x
topology: tpu7x:2x2x1
jax: 0.10.0
libtpu: 0.0.40
codegen_flags: <defaults>
</compile_context>

<pallas_src>
import functools

import jax
import jax.numpy as jnp
from jax import lax
from jax.experimental import pallas as pl
from jax.experimental.pallas import tpu as pltpu

F32 = jnp.float32
BF16 = jnp.bfloat16
I8 = jnp.int8


def _round_up(x, m):
    return (x + m - 1) // m * m


def _elu(x):
    # F.elu (alpha=1); clamp expm1's argument so the dead branch never produces inf.
    return jnp.where(x > 0.0, x, jnp.expm1(jnp.minimum(x, 0.0)))


def _chip_profile():
    """Per-generation knobs derived from the local device (v5e / v6e / v7x)."""
    kind = ""
    try:
        kind = jax.devices()[0].device_kind.lower()
    except Exception:
        pass
    is_v7 = ("v7" in kind) or ("7x" in kind)
    old_vpu = any(t in kind for t in ("v2", "v3", "v4", "v5"))  # no bf16 VPU/EUP
    vmem = 64 * 1024 * 1024 if is_v7 else 128 * 1024 * 1024
    try:
        vmem = int(pltpu.get_tpu_info().vmem_capacity_bytes)
    except Exception:
        pass
    return {
        # keep the N^2 elementwise attention chain in bf16 only on bf16-native VPUs/EUPs
        "bf16_attn": not old_vpu,
        # v7x (~3.2 TB/s HBM): write/read the normalized attention instead of redoing the
        # EUP chain in pass 2; negative on v5e (0.82 TB/s), ~neutral on v6e.
        "stash_attention": is_v7,
        "vmem_limit_bytes": int(vmem * 0.85),
    }


def _plan(n, l, f1, f2, profile, single_buffer_residents):
    """VMEM-budgeted padded dims + destination-row tile TM."""
    lp = _round_up(max(l, 1), 128)
    f1a = _round_up(f1 + 1, 128)   # +1: appended ones column -> row sums fall out of the MXU
    f2a = _round_up(f2 + 1, 128)
    np128 = _round_up(max(n, 1), 128)
    dt_bytes = 2 if profile["bf16_attn"] else 4
    b_res = 1 if single_buffer_residents else 2
    stash = profile["stash_attention"]

    # resident (constant-block-index) inputs, worst of pass 1 / pass 2
    res_p1 = np128 * f1a * 2 + np128 * 4 + f1a * f2a * 2                    # x1, a_src^T, W2
    res_p2 = np128 * f2a * 2 + np128 * 4 + lp * f1a * 2 + f1a * f2a * 2     # h2n, a_src^T, W1, W2
    resident = max(res_p1, res_p2) * b_res

    # per destination row: streamed (double-buffered) tiles + elementwise temporaries
    per_row = (np128 * (1 * 2                        # int8 adjacency tile (2 buffers)
                        + dt_bytes * 2               # attention-chain temporaries
                        + (2 * 2 if stash else 0))   # stashed normalized attention output
               + (f1a + f2a + lp) * 4 * 4)           # f32 feature-space tiles/temps
    headroom = 4 * 1024 * 1024
    budget = max(profile["vmem_limit_bytes"] - resident - headroom, 0)
    tm = (budget // max(per_row, 1)) // 128 * 128
    # TODO(synk): at very large N the resident x1/h2n alone exceed VMEM; switch them to
    # memory_space=pl.ANY + manual double-buffered DMA streaming in that regime.
    tm = min(max(tm, 128), 512)
    tm = min(tm, np128)
    np_ = _round_up(np128, tm)
    return dict(lp=lp, f1a=f1a, f2a=f2a, np_=np_, tm=tm)


def build_adjacency(edge_index, num_nodes, padded_nodes):
    """Dense adj[dst, src] 0/1 (int8) with self-loops on every (incl. padded) row.

    Self-loops keep every rowsum >= 1, so padded outputs stay finite (and 0)."""
    src, dst = edge_index[0], edge_index[1]
    adj = jnp.zeros((padded_nodes, padded_nodes), I8).at[dst, src].set(1)
    diag = jnp.arange(padded_nodes)
    return adj.at[diag, diag].set(1)


def _attention_probs(adj_ref, asrc_t_ref, adst_ref, dt):
    """Unnormalized tied attention p_ij = adj_ij * exp(sigmoid(a_src_j + a_dst_i)) in bf16.

    sigmoid is lowered as 0.5*tanh(0.5*x)+0.5 (one EUP op); its output is in (0,1) so
    exp never overflows, and self-loops keep rowsums >= 1 -> no max-subtraction/-inf
    masking.  Row sums are recovered from the MXU via the appended ones column."""
    logits = adst_ref[...].astype(dt) + asrc_t_ref[...].astype(dt)   # (TM,1)+(1,Np)
    e = jnp.exp(0.5 * jnp.tanh(0.5 * logits) + 0.5)                  # == exp(sigmoid(logits))
    p = e * adj_ref[...].astype(dt)
    return p if dt is BF16 else p.astype(BF16)


# ---------------- pass 0: x1 = X @ W1, attention score pieces, ones column ----------------
def _proj_kernel(x_ref, asrc_vec_ref, adst_vec_ref, w1_ref,
                 x1_ref, asrc_t_ref, adst_ref, *, ones_col):
    x1 = jnp.dot(x_ref[...], w1_ref[...], preferred_element_type=F32)           # (TM, F1a)
    # a_src oriented along lanes (row vector), a_dst along sublanes (column vector).
    asrc_t_ref[...] = lax.dot_general(asrc_vec_ref[...], x1, (((1,), (1,)), ((), ())),
                                      preferred_element_type=F32)               # (1, TM)
    adst_ref[...] = jnp.sum(x1 * adst_vec_ref[...], axis=-1, keepdims=True)     # (TM, 1)
    col = lax.broadcasted_iota(jnp.int32, x1.shape, 1)
    x1_ref[...] = jnp.where(col == ones_col, F32(1.0), x1).astype(BF16)


# ---------------- pass 1: conv1 (attention) + conv2 (+ F.normalize) ----------------
def _conv12_kernel(adj_ref, x1_ref, asrc_t_ref, adst_ref, w2_ref,
                   h2n_ref, h2nb_ref, *maybe_attn, ones1, ones2, attn_dtype, stash):
    p = _attention_probs(adj_ref, asrc_t_ref, adst_ref, attn_dtype)             # (TM, Np) bf16
    agg = jnp.dot(p, x1_ref[...], preferred_element_type=F32)                   # (TM, F1a)
    rowsum = agg[:, ones1:ones1 + 1]                                            # MXU-computed
    recip = pl.reciprocal(jnp.maximum(rowsum, F32(1e-12)), approx=True)         # (TM, 1), EUP
    h1 = _elu(agg * recip)                                                      # ones col -> 1
    h2 = jnp.dot(h1.astype(BF16), w2_ref[...], preferred_element_type=F32)      # (TM, F2a)
    # F.normalize(dim=1): rsqrt on the EUP, no per-element divide.
    inv_norm = lax.rsqrt(jnp.maximum(jnp.sum(h2 * h2, axis=1, keepdims=True), F32(1e-24)))
    h2n = h2 * inv_norm
    h2n_ref[...] = h2n                                                          # f32 result
    col = lax.broadcasted_iota(jnp.int32, h2n.shape, 1)
    h2nb_ref[...] = jnp.where(col == ones2, F32(1.0), h2n).astype(BF16)         # pass-2 input
    if stash:
        maybe_attn[0][...] = p * recip.astype(BF16)                             # normalized A


# ---------------- pass 2: conv3 (tied attention, W2^T) + conv4 (W1^T) ----------------
def _tail_34(agg, w1_ref, w2_ref, h4_ref):
    # elu(A @ (h2 @ W2^T)) == elu((A @ h2) @ W2^T); weights contracted transposed on the fly.
    h3 = _elu(lax.dot_general(agg.astype(BF16), w2_ref[...], (((1,), (1,)), ((), ())),
                              preferred_element_type=F32))                      # (TM, F1a)
    h4_ref[...] = lax.dot_general(h3.astype(BF16), w1_ref[...], (((1,), (1,)), ((), ())),
                                  preferred_element_type=F32)                   # (TM, Lp)


def _conv34_recompute_kernel(adj_ref, h2nb_ref, asrc_t_ref, adst_ref, w1_ref, w2_ref,
                             h4_ref, *, ones2, attn_dtype):
    p = _attention_probs(adj_ref, asrc_t_ref, adst_ref, attn_dtype)
    aggp = jnp.dot(p, h2nb_ref[...], preferred_element_type=F32)                # (TM, F2a)
    recip = pl.reciprocal(jnp.maximum(aggp[:, ones2:ones2 + 1], F32(1e-12)), approx=True)
    _tail_34(aggp * recip, w1_ref, w2_ref, h4_ref)


def _conv34_stash_kernel(attn_ref, h2nb_ref, w1_ref, w2_ref, h4_ref):
    # v7x: attention already normalized in pass 1; HBM re-read beats the EUP recompute.
    agg = jnp.dot(attn_ref[...], h2nb_ref[...], preferred_element_type=F32)     # (TM, F2a)
    _tail_34(agg, w1_ref, w2_ref, h4_ref)


def _gate_forward_impl(features, edge_index, params, profile, single_buffer_residents):
    n, l = features.shape
    w1, w2 = params["w1"], params["w2"]            # [L, F1], [F1, F2]
    att_src, att_dst = params["att_src"], params["att_dst"]
    f1, f2 = w1.shape[1], w2.shape[1]

    plan = _plan(n, l, f1, f2, profile, single_buffer_residents)
    lp, f1a, f2a = plan["lp"], plan["f1a"], plan["f2a"]
    np_, tm = plan["np_"], plan["tm"]
    grid = (np_ // tm,)
    stash = profile["stash_attention"]
    attn_dtype = BF16 if profile["bf16_attn"] else F32

    # Zero padding is exact: padded feature columns / node rows contribute zeros everywhere;
    # column f1 / f2 of x1 / h2n holds a constant 1 so the softmax row-sum is an MXU output.
    x_p = jnp.zeros((np_, lp), BF16).at[:n, :l].set(features.astype(BF16))
    w1_p = jnp.zeros((lp, f1a), BF16).at[:l, :f1].set(w1.astype(BF16))
    w2_p = jnp.zeros((f1a, f2a), BF16).at[:f1, :f2].set(w2.astype(BF16))
    as_p = jnp.zeros((1, f1a), F32).at[:, :f1].set(att_src.astype(F32))
    ad_p = jnp.zeros((1, f1a), F32).at[:, :f1].set(att_dst.astype(F32))
    adj = build_adjacency(edge_index, n, np_)

    cparams = pltpu.CompilerParams(
        # TODO(synk): on v7x verify the row-tile axis actually splits across both TensorCores;
        # if one core idles, switch to pltpu.CORE_PARALLEL / pl.core_map with a core axis.
        dimension_semantics=("parallel",),
        vmem_limit_bytes=profile["vmem_limit_bytes"],
    )

    def resident(shape):
        nd = len(shape)
        if single_buffer_residents:
            # fetched once (constant block index) -> no need to double-buffer in VMEM
            return pl.BlockSpec(shape, lambda i, _nd=nd: (0,) * _nd,
                                pipeline_mode=pl.Buffered(1))
        return pl.BlockSpec(shape, lambda i, _nd=nd: (0,) * _nd)

    def row_tile(cols):
        return pl.BlockSpec((tm, cols), lambda i: (i, 0))

    col_tile = pl.BlockSpec((tm, 1), lambda i: (i, 0))

    # ---- pass 0: projection (bf16 weights) + attention score pieces + ones column
    x1, asrc_t, adst = pl.pallas_call(
        functools.partial(_proj_kernel, ones_col=f1),
        grid=grid,
        in_specs=[row_tile(lp), resident((1, f1a)), resident((1, f1a)), resident((lp, f1a))],
        out_specs=(pl.BlockSpec((tm, f1a), lambda i: (i, 0)),
                   pl.BlockSpec((1, tm), lambda i: (0, i)),
                   col_tile),
        out_shape=(jax.ShapeDtypeStruct((np_, f1a), BF16),
                   jax.ShapeDtypeStruct((1, np_), F32),
                   jax.ShapeDtypeStruct((np_, 1), F32)),
        compiler_params=cparams,
    )(x_p, as_p, ad_p, w1_p)

    # ---- pass 1: conv1 + conv2 -> normalized h2 (f32 + bf16 copy [+ stashed attention])
    p1_out_specs = [pl.BlockSpec((tm, f2a), lambda i: (i, 0)),
                    pl.BlockSpec((tm, f2a), lambda i: (i, 0))]
    p1_out_shape = [jax.ShapeDtypeStruct((np_, f2a), F32),
                    jax.ShapeDtypeStruct((np_, f2a), BF16)]
    if stash:
        p1_out_specs.append(row_tile(np_))
        p1_out_shape.append(jax.ShapeDtypeStruct((np_, np_), BF16))

    p1 = pl.pallas_call(
        functools.partial(_conv12_kernel, ones1=f1, ones2=f2,
                          attn_dtype=attn_dtype, stash=stash),
        grid=grid,
        in_specs=[row_tile(np_),           # int8 adjacency tile (double-buffered stream)
                  resident((np_, f1a)),    # x1 (+ ones col), bf16
                  resident((1, np_)),      # a_src^T
                  col_tile,                # a_dst tile
                  resident((f1a, f2a))],   # W2 (bf16)
        out_specs=tuple(p1_out_specs),
        out_shape=tuple(p1_out_shape),
        compiler_params=cparams,
    )(adj, x1, asrc_t, adst, w2_p)
    h2n, h2nb = p1[0], p1[1]

    # ---- pass 2: conv3 (tied attention) + conv4 -> h4 (needs the complete h2n)
    h4_spec = pl.BlockSpec((tm, lp), lambda i: (i, 0))
    h4_shape = jax.ShapeDtypeStruct((np_, lp), F32)
    if stash:
        h4 = pl.pallas_call(
            _conv34_stash_kernel,
            grid=grid,
            in_specs=[row_tile(np_),          # normalized attention (bf16 stream)
                      resident((np_, f2a)),   # h2n (+ ones col), bf16
                      resident((lp, f1a)),    # W1 (used transposed)
                      resident((f1a, f2a))],  # W2 (used transposed)
            out_specs=h4_spec, out_shape=h4_shape, compiler_params=cparams,
        )(p1[2], h2nb, w1_p, w2_p)
    else:
        h4 = pl.pallas_call(
            functools.partial(_conv34_recompute_kernel, ones2=f2, attn_dtype=attn_dtype),
            grid=grid,
            in_specs=[row_tile(np_),
                      resident((np_, f2a)),
                      resident((1, np_)),
                      col_tile,
                      resident((lp, f1a)),
                      resident((f1a, f2a))],
            out_specs=h4_spec, out_shape=h4_shape, compiler_params=cparams,
        )(adj, h2nb, asrc_t, adst, w1_p, w2_p)

    return h2n[:n, :f2], h4[:n, :l]


def gate_forward(features, edge_index, params):
    profile = _chip_profile()
    try:
        out = _gate_forward_impl(features, edge_index, params, profile,
                                 single_buffer_residents=True)
        jax.block_until_ready(out)
        return out
    except Exception:
        # Fallback for jax versions without BlockSpec(pipeline_mode=pl.Buffered(1)):
        # identical math, default (double) buffering of the resident inputs.
        return _gate_forward_impl(features, edge_index, params, profile,
                                  single_buffer_residents=False)


def init_params(key, number_of_labels, filter_1, filter_2):
    """Deterministic xavier_normal-style init (gain=1.414), like STAGATE's GATConv."""
    k1, k2, k3, k4 = jax.random.split(key, 4)
    gain = 1.414

    def xavier(k, fan_in, fan_out, shape):
        std = gain * (2.0 / (fan_in + fan_out)) ** 0.5
        return std * jax.random.normal(k, shape, jnp.float32)

    return {
        "w1": xavier(k1, number_of_labels, filter_1, (number_of_labels, filter_1)),
        "w2": xavier(k2, filter_1, filter_2, (filter_1, filter_2)),
        "att_src": xavier(k3, 1, filter_1, (1, filter_1)),
        "att_dst": xavier(k4, 1, filter_1, (1, filter_1)),
    }


if __name__ == "__main__":
    key = jax.random.PRNGKey(0)
    k_feat, k_src, k_dst, k_param = jax.random.split(key, 4)

    # small shapes consistent with the module
    N = 16                 # nodes
    number_of_labels = 8   # input feature dim
    filter_1 = 32
    filter_2 = 16
    E = 48                 # edges

    features = jax.random.normal(k_feat, (N, number_of_labels), jnp.float32)
    src = jax.random.randint(k_src, (E,), 0, N)
    dst = jax.random.randint(k_dst, (E,), 0, N)
    edge_index = jnp.stack([src, dst], axis=0)  # [2, E]

    params = init_params(k_param, number_of_labels, filter_1, filter_2)

    h2, h4 = gate_forward(features, edge_index, params)
    jax.block_until_ready((h2, h4))

    assert h2.shape == (N, filter_2)
    assert h4.shape == (N, number_of_labels)
    assert bool(jnp.all(jnp.isfinite(h2))) and bool(jnp.all(jnp.isfinite(h4)))
    print("KERNEL_OK")
</pallas_src>

<mosaic_0001>
module attributes {stable_mosaic.version = 11 : i64} {
  func.func @_proj_kernel(%arg0: i32, %arg1: memref<128x128xbf16, #tpu.memory_space<vmem>>, %arg2: memref<1x128xf32, #tpu.memory_space<vmem>>, %arg3: memref<1x128xf32, #tpu.memory_space<vmem>>, %arg4: memref<128x128xbf16, #tpu.memory_space<vmem>>, %arg5: memref<128x128xbf16, #tpu.memory_space<vmem>>, %arg6: memref<1x128xf32, #tpu.memory_space<vmem>>, %arg7: memref<128x1xf32, #tpu.memory_space<vmem>>) attributes {dimension_semantics = [#tpu.dimension_semantics<parallel>], iteration_bounds = array<i64: 1>, scalar_prefetch = 0 : i64, scratch_operands = 0 : i64, tpu.core_type = #tpu.core_type<tc>, window_params = [{transform_indices = @transform_0, window_bounds = array<i64: 128, 128>}, {pipeline_mode = #tpu.pipeline_mode<synchronous>, transform_indices = @transform_1, window_bounds = array<i64: 1, 128>}, {pipeline_mode = #tpu.pipeline_mode<synchronous>, transform_indices = @transform_2, window_bounds = array<i64: 1, 128>}, {pipeline_mode = #tpu.pipeline_mode<synchronous>, transform_indices = @transform_3, window_bounds = array<i64: 128, 128>}, {transform_indices = @transform_4, window_bounds = array<i64: 128, 128>}, {transform_indices = @transform_5, window_bounds = array<i64: 1, 128>}, {transform_indices = @transform_6, window_bounds = array<i64: 128, 1>}]} {
    %c0 = arith.constant 0 : index
    %c0_0 = arith.constant 0 : index
    %0 = vector.load %arg1[%c0, %c0_0] : memref<128x128xbf16, #tpu.memory_space<vmem>>, vector<128x128xbf16>
    %c0_1 = arith.constant 0 : index
    %c0_2 = arith.constant 0 : index
    %1 = vector.load %arg4[%c0_1, %c0_2] : memref<128x128xbf16, #tpu.memory_space<vmem>>, vector<128x128xbf16>
    %cst = arith.constant dense<0.000000e+00> : vector<128x128xf32>
    %2 = tpu.matmul %0, %1, %cst {dimension_numbers = #tpu.dot_dimension_numbers<[1], [0], [0], [1], [0, 0, 1, 1], [], []>} : vector<128x128xbf16>, vector<128x128xbf16>, vector<128x128xf32> -> vector<128x128xf32>
    %c0_3 = arith.constant 0 : index
    %c0_4 = arith.constant 0 : index
    %3 = vector.load %arg2[%c0_3, %c0_4] : memref<1x128xf32, #tpu.memory_space<vmem>>, vector<1x128xf32>
    %cst_5 = arith.constant dense<0.000000e+00> : vector<1x128xf32>
    %4 = tpu.matmul %3, %2, %cst_5 {dimension_numbers = #tpu.dot_dimension_numbers<[1], [1], [0], [0], [0, 0, 1, 0], [], []>} : vector<1x128xf32>, vector<128x128xf32>, vector<1x128xf32> -> vector<1x128xf32>
    %c0_6 = arith.constant 0 : index
    %c0_7 = arith.constant 0 : index
    %5 = vector.load %arg6[%c0_6, %c0_7] : memref<1x128xf32, #tpu.memory_space<vmem>>, vector<1x128xf32>
    tpu.vector_store %arg6[%c0_6, %c0_7], %4 {strides = array<i32>} : memref<1x128xf32, #tpu.memory_space<vmem>>, vector<1x128xf32>,
    %c0_8 = arith.constant 0 : index
    %c0_9 = arith.constant 0 : index
    %6 = vector.load %arg3[%c0_8, %c0_9] : memref<1x128xf32, #tpu.memory_space<vmem>>, vector<1x128xf32>
    %7 = vector.broadcast %6 : vector<1x128xf32> to vector<128x128xf32>
    %8 = arith.mulf %2, %7 : vector<128x128xf32>
    %cst_10 = arith.constant dense<0.000000e+00> : vector<128xf32>
    %9 = vector.multi_reduction <add>, %8, %cst_10 [1] : vector<128x128xf32> to vector<128xf32>
    %10 = vector.shape_cast %9 : vector<128xf32> to vector<128x1xf32>
    %c0_11 = arith.constant 0 : index
    %c0_12 = arith.constant 0 : index
    %11 = vector.load %arg7[%c0_11, %c0_12] : memref<128x1xf32, #tpu.memory_space<vmem>>, vector<128x1xf32>
    tpu.vector_store %arg7[%c0_11, %c0_12], %10 {strides = array<i32>} : memref<128x1xf32, #tpu.memory_space<vmem>>, vector<128x1xf32>,
    %12 = tpu.iota {dimensions = array<i32: 1>} : vector<128x128xi32>
    %c32_i32 = arith.constant 32 : i32
    %13 = vector.broadcast %c32_i32 : i32 to vector<128x128xi32>
    %14 = arith.cmpi eq, %12, %13 : vector<128x128xi32>
    %cst_13 = arith.constant 1.000000e+00 : f32
    %15 = vector.broadcast %cst_13 : f32 to vector<128x128xf32>
    %16 = arith.select %14, %15, %2 : vector<128x128xi1>, vector<128x128xf32>
    %17 = arith.truncf %16 : vector<128x128xf32> to vector<128x128xbf16>
    %c0_14 = arith.constant 0 : index
    %c0_15 = arith.constant 0 : index
    %18 = vector.load %arg5[%c0_14, %c0_15] : memref<128x128xbf16, #tpu.memory_space<vmem>>, vector<128x128xbf16>
    tpu.vector_store %arg5[%c0_14, %c0_15], %17 {strides = array<i32>} : memref<128x128xbf16, #tpu.memory_space<vmem>>, vector<128x128xbf16>,
    return
  }
  func.func @transform_0(%arg0: i32) -> (i32, i32) {
    %c0_i32 = arith.constant 0 : i32
    %c0_i32_0 = arith.constant 0 : i32
    return %arg0, %c0_i32 : i32, i32
  }
  func.func @transform_1(%arg0: i32) -> (i32, i32) {
    %c0_i32 = arith.constant 0 : i32
    %c0_i32_0 = arith.constant 0 : i32
    %c0_i32_1 = arith.constant 0 : i32
    return %c0_i32, %c0_i32_0 : i32, i32
  }
  func.func @transform_2(%arg0: i32) -> (i32, i32) {
    %c0_i32 = arith.constant 0 : i32
    %c0_i32_0 = arith.constant 0 : i32
    %c0_i32_1 = arith.constant 0 : i32
    return %c0_i32, %c0_i32_0 : i32, i32
  }
  func.func @transform_3(%arg0: i32) -> (i32, i32) {
    %c0_i32 = arith.constant 0 : i32
    %c0_i32_0 = arith.constant 0 : i32
    %c0_i32_1 = arith.constant 0 : i32
    return %c0_i32, %c0_i32_0 : i32, i32
  }
  func.func @transform_4(%arg0: i32) -> (i32, i32) {
    %c0_i32 = arith.constant 0 : i32
    %c0_i32_0 = arith.constant 0 : i32
    return %arg0, %c0_i32 : i32, i32
  }
  func.func @transform_5(%arg0: i32) -> (i32, i32) {
    %c0_i32 = arith.constant 0 : i32
    %c0_i32_0 = arith.constant 0 : i32
    return %c0_i32, %arg0 : i32, i32
  }
  func.func @transform_6(%arg0: i32) -> (i32, i32) {
    %c0_i32 = arith.constant 0 : i32
    %c0_i32_0 = arith.constant 0 : i32
    return %arg0, %c0_i32 : i32, i32
  }
}

module attributes {stable_mosaic.version = 11 : i64} {
  func.func @_proj_kernel(%arg0: i32, %arg1: memref<128x128xbf16, #tpu.memory_space<vmem>>, %arg2: memref<1x128xf32, #tpu.memory_space<vmem>>, %arg3: memref<1x128xf32, #tpu.memory_space<vmem>>, %arg4: memref<128x128xbf16, #tpu.memory_space<vmem>>, %arg5: memref<128x128xbf16, #tpu.memory_space<vmem>>, %arg6: memref<1x128xf32, #tpu.memory_space<vmem>>, %arg7: memref<128x1xf32, #tpu.memory_space<vmem>>) attributes {dimension_semantics = [#tpu.dimension_semantics<parallel>], iteration_bounds = array<i64: 1>, scalar_prefetch = 0 : i64, scratch_operands = 0 : i64, tpu.core_type = #tpu.core_type<tc>, window_params = [{transform_indices = @transform_0, window_bounds = array<i64: 128, 128>}, {pipeline_mode = #tpu.pipeline_mode<synchronous>, transform_indices = @transform_1, window_bounds = array<i64: 1, 128>}, {pipeline_mode = #tpu.pipeline_mode<synchronous>, transform_indices = @transform_2, window_bounds = array<i64: 1, 128>}, {pipeline_mode = #tpu.pipeline_mode<synchronous>, transform_indices = @transform_3, window_bounds = array<i64: 128, 128>}, {transform_indices = @transform_4, window_bounds = array<i64: 128, 128>}, {transform_indices = @transform_5, window_bounds = array<i64: 1, 128>}, {transform_indices = @transform_6, window_bounds = array<i64: 128, 1>}]} {
    %c0 = arith.constant 0 : index
    %c0_0 = arith.constant 0 : index
    %0 = vector.load %arg1[%c0, %c0_0] : memref<128x128xbf16, #tpu.memory_space<vmem>>, vector<128x128xbf16>
    %c0_1 = arith.constant 0 : index
    %c0_2 = arith.constant 0 : index
    %1 = vector.load %arg4[%c0_1, %c0_2] : memref<128x128xbf16, #tpu.memory_space<vmem>>, vector<128x128xbf16>
    %cst = arith.constant dense<0.000000e+00> : vector<128x128xf32>
    %2 = tpu.matmul %0, %1, %cst {dimension_numbers = #tpu.dot_dimension_numbers<[1], [0], [0], [1], [0, 0, 1, 1], [], []>} : vector<128x128xbf16>, vector<128x128xbf16>, vector<128x128xf32> -> vector<128x128xf32>
    %c0_3 = arith.constant 0 : index
    %c0_4 = arith.constant 0 : index
    %3 = vector.load %arg2[%c0_3, %c0_4] : memref<1x128xf32, #tpu.memory_space<vmem>>, vector<1x128xf32>
    %cst_5 = arith.constant dense<0.000000e+00> : vector<1x128xf32>
    %4 = tpu.matmul %3, %2, %cst_5 {dimension_numbers = #tpu.dot_dimension_numbers<[1], [1], [0], [0], [0, 0, 1, 0], [], []>} : vector<1x128xf32>, vector<128x128xf32>, vector<1x128xf32> -> vector<1x128xf32>
    %c0_6 = arith.constant 0 : index
    %c0_7 = arith.constant 0 : index
    %5 = vector.load %arg6[%c0_6, %c0_7] : memref<1x128xf32, #tpu.memory_space<vmem>>, vector<1x128xf32>
    tpu.vector_store %arg6[%c0_6, %c0_7], %4 {strides = array<i32>} : memref<1x128xf32, #tpu.memory_space<vmem>>, vector<1x128xf32>,
    %c0_8 = arith.constant 0 : index
    %c0_9 = arith.constant 0 : index
    %6 = vector.load %arg3[%c0_8, %c0_9] : memref<1x128xf32, #tpu.memory_space<vmem>>, vector<1x128xf32>
    %7 = vector.broadcast %6 : vector<1x128xf32> to vector<128x128xf32>
    %8 = arith.mulf %2, %7 : vector<128x128xf32>
    %cst_10 = arith.constant dense<0.000000e+00> : vector<128xf32>
    %9 = vector.multi_reduction <add>, %8, %cst_10 [1] : vector<128x128xf32> to vector<128xf32>
    %10 = vector.shape_cast %9 : vector<128xf32> to vector<128x1xf32>
    %c0_11 = arith.constant 0 : index
    %c0_12 = arith.constant 0 : index
    %11 = vector.load %arg7[%c0_11, %c0_12] : memref<128x1xf32, #tpu.memory_space<vmem>>, vector<128x1xf32>
    tpu.vector_store %arg7[%c0_11, %c0_12], %10 {strides = array<i32>} : memref<128x1xf32, #tpu.memory_space<vmem>>, vector<128x1xf32>,
    %12 = tpu.iota {dimensions = array<i32: 1>} : vector<128x128xi32>
    %c32_i32 = arith.constant 32 : i32
    %13 = vector.broadcast %c32_i32 : i32 to vector<128x128xi32>
    %14 = arith.cmpi eq, %12, %13 : vector<128x128xi32>
    %cst_13 = arith.constant 1.000000e+00 : f32
    %15 = vector.broadcast %cst_13 : f32 to vector<128x128xf32>
    %16 = arith.select %14, %15, %2 : vector<128x128xi1>, vector<128x128xf32>
    %17 = arith.truncf %16 : vector<128x128xf32> to vector<128x128xbf16>
    %c0_14 = arith.constant 0 : index
    %c0_15 = arith.constant 0 : index
    %18 = vector.load %arg5[%c0_14, %c0_15] : memref<128x128xbf16, #tpu.memory_space<vmem>>, vector<128x128xbf16>
    tpu.vector_store %arg5[%c0_14, %c0_15], %17 {strides = array<i32>} : memref<128x128xbf16, #tpu.memory_space<vmem>>, vector<128x128xbf16>,
    return
  }
  func.func @transform_0(%arg0: i32) -> (i32, i32) {
    %c0_i32 = arith.constant 0 : i32
    %c0_i32_0 = arith.constant 0 : i32
    return %arg0, %c0_i32 : i32, i32
  }
  func.func @transform_1(%arg0: i32) -> (i32, i32) {
    %c0_i32 = arith.constant 0 : i32
    %c0_i32_0 = arith.constant 0 : i32
    %c0_i32_1 = arith.constant 0 : i32
    return %c0_i32, %c0_i32_0 : i32, i32
  }
  func.func @transform_2(%arg0: i32) -> (i32, i32) {
    %c0_i32 = arith.constant 0 : i32
    %c0_i32_0 = arith.constant 0 : i32
    %c0_i32_1 = arith.constant 0 : i32
    return %c0_i32, %c0_i32_0 : i32, i32
  }
  func.func @transform_3(%arg0: i32) -> (i32, i32) {
    %c0_i32 = arith.constant 0 : i32
    %c0_i32_0 = arith.constant 0 : i32
    %c0_i32_1 = arith.constant 0 : i32
    return %c0_i32, %c0_i32_0 : i32, i32
  }
  func.func @transform_4(%arg0: i32) -> (i32, i32) {
    %c0_i32 = arith.constant 0 : i32
    %c0_i32_0 = arith.constant 0 : i32
    return %arg0, %c0_i32 : i32, i32
  }
  func.func @transform_5(%arg0: i32) -> (i32, i32) {
    %c0_i32 = arith.constant 0 : i32
    %c0_i32_0 = arith.constant 0 : i32
    return %c0_i32, %arg0 : i32, i32
  }
  func.func @transform_6(%arg0: i32) -> (i32, i32) {
    %c0_i32 = arith.constant 0 : i32
    %c0_i32_0 = arith.constant 0 : i32
    return %arg0, %c0_i32 : i32, i32
  }
}

</mosaic_0001>

<bundles_post_ra>
// kernel: tpu_custom_call.1
= control target key start
LH: loop header
LB: loop body
LE: loop exit
PB: predicated region body
PF: predicated region fallthrough
CT: control target
= control target key end

     0   :  { %12 = vsyncpa [#allocation3], 0  ;;  %s1249_s0 = inlined_call_operand.hbm [shape: bf16[128,128], index: 0, kind: input, shape index: {}]   ;;  %s1250_s1 = inlined_call_operand.hbm [shape: f32[1,128], index: 1, kind: input, shape index: {}]   ;;  %s1251_s2 = inlined_call_operand.hbm [shape: f32[1,128], index: 2, kind: input, shape index: {}]   ;;  %s1252_s3 = inlined_call_operand.hbm [shape: bf16[128,128], index: 3, kind: input, shape index: {}]   ;;  %s1253_s4 = inlined_call_operand.hbm [shape: bf16[128,128], index: 4, kind: output, shape index: {0}]   ;;  %s1254_s5 = inlined_call_operand.hbm [shape: f32[1,128], index: 5, kind: output, shape index: {1}]   ;;  %s1255_s6 = inlined_call_operand.hbm [shape: f32[128,1], index: 6, kind: output, shape index: {2}]  }
   0x1   :  { %13 = vsyncpa [#allocation6], 0 }
   0x2   :  { %14 = vsyncpa [#allocation9], 0 }
   0x3   :  { %15 = vsyncpa [#allocation4], 0 }
   0x4   :  { %16 = vsyncpa [#allocation12], 0  ;;  %s1004_s21 = smov [#allocation5]   ;;  %s1005_s23 = smov [#allocation2]  }
   0x5   :  { %s35_s22 = sshll.u32 %s1004_s21, 4  ;;  %s22_s24 = sshll.u32 %s1005_s23, 4  ;;  %s36_s22 = int_to_ptr.vmem [resolvable:$true] %s35_s22  ;;  %s1053_s24 = int_to_ptr.vmem [resolvable:$true] %s22_s24 }
   0x6   :  { %s840_s27 = scalar_lea.hbm %s1250_s1, 16 }
   0x7   :  { %p841_p0 = scmp.ne.s32.totalorder %s1250_s1, %s840_s27  ;;  %p844_p1 = scmp.lt.u32.totalorder %s840_s27, %s1250_s1 }
   0x9   :  { %p846_p2 = pnand %p844_p1, %p841_p0 }
   0xb   :  { %849 = shalt.err (!%p846_p2)
}
   0xc   :  { %s850_s8 = scalar_lea.vmem %s36_s22, 16  ;;  %s854_s9 = scalar_lea.vmem %s36_s22, 32 }
   0xd   :  { %p851_p3 = scmp.ne.s32.totalorder %s36_s22, %s850_s8  ;;  %p855_p4 = scmp.lt.s32.totalorder %s36_s22, %s36_s22 }
   0xe   :  { %p856_p5 = scmp.lt.s32.totalorder %s854_s9, %s850_s8 }
  0x10   :  { %p857_p6 = por %p856_p5, %p855_p4 }
  0x12   :  { %p858_p7 = pnand %p857_p6, %p851_p3 }
  0x14   :  { %861 = shalt.err (!%p858_p7)
}
  0x15   :  { %38 = dma.hbm_to_vmem [thread:$0]  %s1250_s1, 16, %s36_s22, [#allocation6]  }
  0x16   :  { %s862_s14 = scalar_lea.hbm %s1249_s0, 1024 }
  0x17   :  { %p863_p8 = scmp.ne.s32.totalorder %s1249_s0, %s862_s14  ;;  %p866_p9 = scmp.lt.u32.totalorder %s862_s14, %s1249_s0 }
  0x19   :  { %p868_p10 = pnand %p866_p9, %p863_p8 }
  0x1b   :  { %871 = shalt.err (!%p868_p10)
}
  0x1c   :  { %s872_s19 = scalar_lea.vmem %s1053_s24, 1024  ;;  %p877_p12 = scmp.lt.s32.totalorder %s1053_s24, %s1053_s24 }
  0x1d   :  { %p873_p11 = scmp.ne.s32.totalorder %s1053_s24, %s872_s19  ;;  %p878_p13 = scmp.lt.s32.totalorder %s872_s19, %s872_s19 }
  0x1f   :  { %p879_p0 = por %p878_p13, %p877_p12 }
  0x21   :  { %p880_p1 = pnand %p879_p0, %p873_p11 }
  0x23   :  { %883 = shalt.err (!%p880_p1)
}
  0x24   :  { %s1006_s1 = smov 64   ;;  %s1007_s20 = smov 4  }
  0x25   :  { %28 = dma.hbm_to_vmem [thread:$0]  %s1249_s0, 1024, %s1053_s24, [#allocation3], %s1006_s1, %s1006_s1, %s1007_s20  }
  0x26   :  { %s1008_s23 = smov [#allocation7]   ;;  %s1009_s26 = smov [#allocation8]  }
  0x27   :  { %s45_s25 = sshll.u32 %s1008_s23, 4  ;;  %s54_s27 = sshll.u32 %s1009_s26, 4  ;;  %s46_s25 = int_to_ptr.vmem [resolvable:$true] %s45_s25  ;;  %s1087_s27 = int_to_ptr.vmem [resolvable:$true] %s54_s27 }
  0x28   :  { %s884_s30 = scalar_lea.hbm %s1251_s2, 16 }
  0x29   :  { %p885_p2 = scmp.ne.s32.totalorder %s1251_s2, %s884_s30  ;;  %p888_p3 = scmp.lt.u32.totalorder %s884_s30, %s1251_s2 }
  0x2b   :  { %p890_p4 = pnand %p888_p3, %p885_p2 }
  0x2d   :  { %893 = shalt.err (!%p890_p4)
}
  0x2e   :  { %s894_s0 = scalar_lea.vmem %s46_s25, 16  ;;  %s898_s24 = scalar_lea.vmem %s46_s25, 32 }
  0x2f   :  { %p895_p5 = scmp.ne.s32.totalorder %s46_s25, %s894_s0  ;;  %p899_p6 = scmp.lt.s32.totalorder %s46_s25, %s46_s25 }
  0x30   :  { %p900_p7 = scmp.lt.s32.totalorder %s898_s24, %s894_s0 }
  0x32   :  { %p901_p8 = por %p900_p7, %p899_p6 }
  0x34   :  { %p902_p9 = pnand %p901_p8, %p895_p5 }
  0x36   :  { %905 = shalt.err (!%p902_p9)
}
  0x37   :  { %48 = dma.hbm_to_vmem [thread:$0]  %s1251_s2, 16, %s46_s25, [#allocation6]  }
  0x38   :  { %s906_s15 = scalar_lea.hbm %s1252_s3, 1024 }
  0x39   :  { %p907_p10 = scmp.ne.s32.totalorder %s1252_s3, %s906_s15  ;;  %p910_p11 = scmp.lt.u32.totalorder %s906_s15, %s1252_s3 }
  0x3b   :  { %p912_p12 = pnand %p910_p11, %p907_p10 }
  0x3d   :  { %915 = shalt.err (!%p912_p12)
}
  0x3e   :  { %s916_s21 = scalar_lea.vmem %s1087_s27, 1024  ;;  %p921_p0 = scmp.lt.s32.totalorder %s1087_s27, %s1087_s27 }
  0x3f   :  { %p917_p13 = scmp.ne.s32.totalorder %s1087_s27, %s916_s21  ;;  %p922_p1 = scmp.lt.s32.totalorder %s916_s21, %s916_s21 }
  0x41   :  { %p923_p2 = por %p922_p1, %p921_p0 }
  0x43   :  { %p924_p3 = pnand %p923_p2, %p917_p13 }
  0x45   :  { %927 = shalt.err (!%p924_p3)
}
  0x46   :  { %60 = dma.hbm_to_vmem [thread:$0]  %s1252_s3, 1024, %s1087_s27, [#allocation9], %s1006_s1, %s1006_s1, %s1007_s20  }
  0x47   :  { %994 = dma.done.wait [#allocation3], 1024  }
  0x48   :  { %995 = vsyncadd [#allocation3], 4294966272 }
  0x49   :  { %996 = dma.done.wait [#allocation6], 32  }
  0x4a   :  { %997 = vsyncadd [#allocation6], 4294967264 }
  0x4b   :  { %998 = dma.done.wait [#allocation9], 1024  }
  0x4c   :  { %999 = vsyncadd [#allocation9], 4294966272  ;;  %v824_v0 = vld [vmem:[#allocation8] sm:$0xff]   ;;  %v825_v1 = vld [vmem:[#allocation8 + $0x8] sm:$0xff]   ;;  %v1010_v16 = vmov 0.0|0.0   ;;  %vm1011_vm0 = vmmov 0   ;;  %v443_v18 = vlaneseq }
  0x4d   :  { %719 = vmatprep.subr.bf16.mxu0 %v824_v0  ;;  %v826_v2 = vld [vmem:[#allocation8 + $0x10] sm:$0xff]   ;;  %v827_v3 = vld [vmem:[#allocation8 + $0x18] sm:$0xff]   ;;  %v828_v5 = vld [vmem:[#allocation8 + $0x20] sm:$0xff]   ;;  %786 = vmatprep.subr.bf16.mxu1 %v1010_v16  ;;  %v1012_v17 = vmov 0.0   ;;  %vm426_vm2 = vcmask 7168   ;;  %s1013_s3 = smov [#allocation10]  }
  0x4e   :  { %720 = vmatpush3.bf16.msra.mxu0 %v824_v0  ;;  %v832_v4 = vld [vmem:[#allocation2] sm:$0xff]   ;;  %v829_v6 = vld [vmem:[#allocation8 + $0x28] sm:$0xff]   ;;  %v830_v7 = vld [vmem:[#allocation8 + $0x30] sm:$0xff]   ;;  %783 = vmatprep.mubr.msk.f32.mxu1 %vm1011_vm0, %v1012_v17  ;;  %v1122_v19 = vand.u32 127, %v443_v18  ;;  %s547_s23 = sshll.u32 %s1013_s3, 4  ;;  %s548_s23 = int_to_ptr.vmem [resolvable:$true] %s547_s23 }
  0x4f   :  { %721 = vmatprep.subr.bf16.mxu0 %v825_v1  ;;  %735 = vmatprep.mubr.bf16.mxu0 %v832_v4  ;;  %v831_v8 = vld [vmem:[#allocation8 + $0x38] sm:$0xff]   ;;  %v833_v9 = vld [vmem:[#allocation2 + $0x8] sm:$0xff]   ;;  %v834_v10 = vld [vmem:[#allocation2 + $0x10] sm:$0xff]   ;;  %s928_s25 = scalar_lea.vmem %s548_s23, 1024  ;;  %p933_p5 = scmp.lt.s32.totalorder %s548_s23, %s548_s23 }
  0x50   :  { %v835_v11 = vld [vmem:[#allocation2 + $0x18] sm:$0xff]   ;;  %v836_v12 = vld [vmem:[#allocation2 + $0x20] sm:$0xff]   ;;  %v837_v13 = vld [vmem:[#allocation2 + $0x28] sm:$0xff]   ;;  %vm445_vm1 = vcmp.eq.s32.totalorder %v1122_v19, 32  ;;  %p929_p4 = scmp.ne.s32.totalorder %s548_s23, %s928_s25  ;;  %p934_p6 = scmp.lt.s32.totalorder %s928_s25, %s928_s25 }
  0x51   :  { %v838_v14 = vld [vmem:[#allocation2 + $0x30] sm:$0xff]   ;;  %v839_v15 = vld [vmem:[#allocation2 + $0x38] sm:$0xff]   ;;  %v1124_v20 = vld [vmem:[#allocation7] ss:$0 sm:$0xff] }
  0x52   :  { %722 = vmatpush3.bf16.msra.mxu0 %v825_v1  ;;  %v299_v19 = vld [vmem:[#allocation5] sm:$0x1]  ;;  %p935_p7 = por %p934_p6, %p933_p5 }
  0x53   :  { %723 = vmatprep.subr.bf16.mxu0 %v826_v2 }
  0x54   :  { %p936_p8 = pnand %p935_p7, %p929_p4 }
  0x56   :  { %724 = vmatpush3.bf16.msra.mxu0 %v826_v2 }
  0x57   :  { %725 = vmatprep.subr.bf16.mxu0 %v827_v3 }
  0x5a   :  { %726 = vmatpush3.bf16.msra.mxu0 %v827_v3 }
  0x5b   :  { %727 = vmatprep.subr.bf16.mxu0 %v828_v5 }
  0x5e   :  { %728 = vmatpush3.bf16.msra.mxu0 %v828_v5 }
  0x5f   :  { %729 = vmatprep.subr.bf16.mxu0 %v829_v6 }
  0x62   :  { %730 = vmatpush3.bf16.msra.mxu0 %v829_v6 }
  0x63   :  { %731 = vmatprep.subr.bf16.mxu0 %v830_v7 }
  0x66   :  { %732 = vmatpush3.bf16.msra.mxu0 %v830_v7 }
  0x67   :  { %733 = vmatprep.subr.bf16.mxu0 %v831_v8 }
  0x6a   :  { %734 = vmatpush3.bf16.msra.mxu0 %v831_v8 }
  0x6d   :  { %736 = vmatmul.mubr.bf16.vlgmr.msra.gmra.mrb[0].mxu0 %v833_v9 }
  0x6e   :  { %739 = vmatprep.mubr.bf16.mxu0 %v834_v10 }
  0x75   :  { %740 = vmatmul.mubr.bf16.gmra.mrb[4].mxu0 %v835_v11 }
  0x76   :  { %743 = vmatprep.mubr.bf16.mxu0 %v836_v12 }
  0x7d   :  { %744 = vmatmul.mubr.bf16.gmra.mrb[8].mxu0 %v837_v13 }
  0x7e   :  { %747 = vmatprep.mubr.bf16.mxu0 %v838_v14 }
  0x85   :  { %748 = vmatmul.mubr.bf16.gmra.mrb[12].mxu0 %v839_v15 }
 0x140   :  { %v737_v21 = vpop.f32.mrb[0].mxu0 }
 0x141   :  { %v236_v22 = vpop.f32.mrb[1].mxu0  ;;  %v380_v23 = vmul.f32 %v737_v21, %v1124_v20  ;;  %v448_v26 = vsel %vm445_vm1, 1.0, %v737_v21 }
 0x142   :  { %v738_v24 = vpop.f32.mrb[2].mxu0  ;;  %v378_v25 = vmul.f32 %v1124_v20, %v236_v22  ;;  %v446_v30 = vsel %vm445_vm1, 1.0, %v236_v22 }
 0x143   :  { %v790_v27 = vpack.c.bf16 %v738_v24, %v737_v21  ;;  %v449_v28 = vsel %vm445_vm1, 1.0, %v738_v24  ;;  %398 = vadd.xlane.f32.xlu1 %v380_v23  ;;  %v239_v29 = vpop.f32.mrb[3].mxu0  ;;  %v381_v35 = vmul.f32 %v738_v24, %v1124_v20 }
 0x144   :  { %v647_v31 = vpack.c.bf16 %v449_v28, %v448_v26  ;;  %v447_v32 = vsel %vm445_vm1, 1.0, %v239_v29  ;;  %394 = vadd.xlane.f32.xlu0 %v378_v25  ;;  %v787_v33 = vpack.c.bf16 %v239_v29, %v236_v22  ;;  %v379_v36 = vmul.f32 %v1124_v20, %v239_v29 }
 0x145   :  { %v642_v34 = vpack.c.bf16 %v447_v32, %v446_v30 }
 0x146   :  { %679 = vst [vmem:[#allocation10 + $0x8] sm:$0xff] %v647_v31   ;;  %788 = vmatpush3.bf16.xpose.msra.mxu1 %v787_v33 }
 0x147   :  { %643 = vst [vmem:[#allocation10] sm:$0xff] %v642_v34   ;;  %400 = vadd.xlane.f32.xlu1 %v381_v35  ;;  %789 = vmatprep.subr.bf16.mxu1 %v1010_v16 }
 0x148   :  { %396 = vadd.xlane.f32.xlu0 %v379_v36  ;;  %v1140_v37 = vpop.f32.mrb[4].mxu0 }
 0x149   :  { %v452_v38 = vsel %vm445_vm1, 1.0, %v1140_v37  ;;  %v252_v39 = vpop.f32.mrb[5].mxu0  ;;  %v384_v40 = vmul.f32 %v1140_v37, %v1124_v20 }
 0x14a   :  { %v450_v41 = vsel %vm445_vm1, 1.0, %v252_v39  ;;  %v742_v42 = vpop.f32.mrb[6].mxu0  ;;  %v382_v50 = vmul.f32 %v1124_v20, %v252_v39 }
 0x14b   :  { %v796_v43 = vpack.c.bf16 %v742_v42, %v1140_v37  ;;  %v453_v44 = vsel %vm445_vm1, 1.0, %v742_v42  ;;  %v385_v45 = vmul.f32 %v742_v42, %v1124_v20  ;;  %v255_v46 = vpop.f32.mrb[7].mxu0 }
 0x14c   :  { %v657_v47 = vpack.c.bf16 %v453_v44, %v452_v38  ;;  %406 = vadd.xlane.f32.xlu0 %v384_v40  ;;  %v793_v48 = vpack.c.bf16 %v255_v46, %v252_v39  ;;  %v451_v49 = vsel %vm445_vm1, 1.0, %v255_v46  ;;  %v383_v52 = vmul.f32 %v1124_v20, %v255_v46 }
 0x14d   :  { %408 = vadd.xlane.f32.xlu1 %v385_v45  ;;  %v652_v51 = vpack.c.bf16 %v451_v49, %v450_v41 }
 0x14e   :  { %681 = vst [vmem:[#allocation10 + $0x18] sm:$0xff] %v657_v47   ;;  %791 = vmatpush3.bf16.xpose.msra.mxu1 %v790_v27 }
 0x14f   :  { %680 = vst [vmem:[#allocation10 + $0x10] sm:$0xff] %v652_v51   ;;  %792 = vmatprep.subr.bf16.mxu1 %v1010_v16 }
 0x150   :  { %402 = vadd.xlane.f32.xlu0 %v382_v50  ;;  %v745_v53 = vpop.f32.mrb[8].mxu0 }
 0x151   :  { %404 = vadd.xlane.f32.xlu1 %v383_v52  ;;  %v456_v54 = vsel %vm445_vm1, 1.0, %v745_v53  ;;  %v268_v55 = vpop.f32.mrb[9].mxu0  ;;  %v388_v56 = vmul.f32 %v745_v53, %v1124_v20 }
 0x152   :  { %v454_v57 = vsel %vm445_vm1, 1.0, %v268_v55  ;;  %v746_v58 = vpop.f32.mrb[10].mxu0  ;;  %v386_v2 = vmul.f32 %v1124_v20, %v268_v55 }
 0x153   :  { %v802_v59 = vpack.c.bf16 %v746_v58, %v745_v53  ;;  %v457_v60 = vsel %vm445_vm1, 1.0, %v746_v58  ;;  %v389_v61 = vmul.f32 %v746_v58, %v1124_v20  ;;  %v271_v62 = vpop.f32.mrb[11].mxu0 }
 0x154   :  { %v667_v63 = vpack.c.bf16 %v457_v60, %v456_v54  ;;  %414 = vadd.xlane.f32.xlu0 %v388_v56  ;;  %v799_v0 = vpack.c.bf16 %v271_v62, %v268_v55  ;;  %v455_v1 = vsel %vm445_vm1, 1.0, %v271_v62  ;;  %v387_v4 = vmul.f32 %v1124_v20, %v271_v62 }
 0x155   :  { %416 = vadd.xlane.f32.xlu1 %v389_v61  ;;  %v662_v3 = vpack.c.bf16 %v455_v1, %v454_v57 }
 0x156   :  { %794 = vmatpush3.bf16.xpose.msra.mxu1 %v793_v48  ;;  %683 = vst [vmem:[#allocation10 + $0x28] sm:$0xff] %v667_v63  }
 0x157   :  { %795 = vmatprep.subr.bf16.mxu1 %v1010_v16  ;;  %682 = vst [vmem:[#allocation10 + $0x20] sm:$0xff] %v662_v3  }
 0x158   :  { %410 = vadd.xlane.f32.xlu0 %v386_v2  ;;  %v749_v5 = vpop.f32.mrb[12].mxu0 }
 0x159   :  { %412 = vadd.xlane.f32.xlu1 %v387_v4  ;;  %v460_v6 = vsel %vm445_vm1, 1.0, %v749_v5  ;;  %v284_v7 = vpop.f32.mrb[13].mxu0  ;;  %v392_v14 = vmul.f32 %v749_v5, %v1124_v20 }
 0x15a   :  { %v458_v8 = vsel %vm445_vm1, 1.0, %v284_v7  ;;  %v750_v9 = vpop.f32.mrb[14].mxu0  ;;  %v390_v10 = vmul.f32 %v1124_v20, %v284_v7 }
 0x15b   :  { %v808_v11 = vpack.c.bf16 %v750_v9, %v749_v5  ;;  %v461_v12 = vsel %vm445_vm1, 1.0, %v750_v9  ;;  %v287_v13 = vpop.f32.mrb[15].mxu0  ;;  %v393_v23 = vmul.f32 %v750_v9, %v1124_v20 }
 0x15c   :  { %v677_v15 = vpack.c.bf16 %v461_v12, %v460_v6  ;;  %v805_v17 = vpack.c.bf16 %v287_v13, %v284_v7  ;;  %v459_v18 = vsel %vm445_vm1, 1.0, %v287_v13  ;;  %418 = vadd.xlane.f32.xlu0 %v390_v10  ;;  %v391_v21 = vmul.f32 %v1124_v20, %v287_v13 }
 0x15d   :  { %v672_v22 = vpack.c.bf16 %v459_v18, %v458_v8 }
 0x15e   :  { %797 = vmatpush3.bf16.xpose.msra.mxu1 %v796_v43  ;;  %685 = vst [vmem:[#allocation10 + $0x38] sm:$0xff] %v677_v15   ;;  %420 = vadd.xlane.f32.xlu1 %v391_v21 }
 0x15f   :  { %798 = vmatprep.subr.bf16.mxu1 %v1010_v16  ;;  %684 = vst [vmem:[#allocation10 + $0x30] sm:$0xff] %v672_v22  }
 0x160   :  { %422 = vadd.xlane.f32.xlu0 %v392_v14 }
 0x162   :  { %424 = vadd.xlane.f32.xlu1 %v393_v23 }
 0x166   :  { %800 = vmatpush3.bf16.xpose.msra.mxu1 %v799_v0 }
 0x167   :  { %801 = vmatprep.subr.bf16.mxu1 %v1010_v16 }
 0x16e   :  { %803 = vmatpush3.bf16.xpose.msra.mxu1 %v802_v59 }
 0x16f   :  { %804 = vmatprep.subr.bf16.mxu1 %v1010_v16 }
 0x176   :  { %806 = vmatpush3.bf16.xpose.msra.mxu1 %v805_v17 }
 0x177   :  { %807 = vmatprep.subr.bf16.mxu1 %v1010_v16 }
 0x17e   :  { %809 = vmatpush3.bf16.xpose.msra.mxu1 %v808_v11 }
 0x185   :  { %784 = vmatmul.mubr.f32.vlgmr.msra.gmra.mrb[0].mxu1 %v299_v19 }
 0x1d0   :  { %v399_v24 = vpop.xlane.xlu1 %398 }
 0x1d1   :  { %429 = vst.msk [vmem:[#allocation13 + $0x10] sm:$0xff] %vm426_vm2, %v399_v24  ;;  %v395_v20 = vpop.xlane.xlu0 %394 }
 0x1d2   :  { %427 = vst.msk [vmem:[#allocation13] sm:$0xff] %vm426_vm2, %v395_v20 }
 0x1d4   :  { %v401_v25 = vpop.xlane.xlu1 %400 }
 0x1d5   :  { %430 = vst.msk [vmem:[#allocation13 + $0x18] sm:$0xff] %vm426_vm2, %v401_v25  ;;  %v397_v26 = vpop.xlane.xlu0 %396 }
 0x1d6   :  { %428 = vst.msk [vmem:[#allocation13 + $0x8] sm:$0xff] %vm426_vm2, %v397_v26 }
 0x1d9   :  { %v407_v27 = vpop.xlane.xlu0 %406 }
 0x1da   :  { %433 = vst.msk [vmem:[#allocation13 + $0x30] sm:$0xff] %vm426_vm2, %v407_v27  ;;  %v409_v16 = vpop.xlane.xlu1 %408 }
 0x1db   :  { %434 = vst.msk [vmem:[#allocation13 + $0x38] sm:$0xff] %vm426_vm2, %v409_v16 }
 0x1dc   :  { %939 = shalt.err (!%p936_p8)
}
 0x1dd   :  { %s940_s28 = scalar_lea.hbm %s1253_s4, 1024 }
 0x1de   :  { %p941_p9 = scmp.ne.s32.totalorder %s1253_s4, %s940_s28  ;;  %p944_p10 = scmp.lt.u32.totalorder %s940_s28, %s1253_s4 }
 0x1e0   :  { %p946_p11 = pnand %p944_p10, %p941_p9 }
 0x1e2   :  { %949 = shalt.err (!%p946_p11)
}
 0x1e3   :  { %553 = dma.vmem_to_hbm [thread:$0]  %s548_s23, 1024, %s1253_s4, [#allocation4], %s1006_s1, %s1006_s1, %s1007_s20   ;;  %v403_v28 = vpop.xlane.xlu0 %402  ;;  %v405_v29 = vpop.xlane.xlu1 %404 }
 0x1e4   :  { %431 = vst.msk [vmem:[#allocation13 + $0x20] sm:$0xff] %vm426_vm2, %v403_v28  ;;  %432 = vst.msk [vmem:[#allocation13 + $0x28] sm:$0xff] %vm426_vm2, %v405_v29  ;;  %s1014_s4 = smov [#allocation11]   ;;  %s1015_s20 = smov [#allocation13]  }
 0x1e5   :  { %s560_s1 = sshll.u32 %s1014_s4, 4  ;;  %s569_s0 = sshll.u32 %s1015_s20, 4  ;;  %s561_s1 = int_to_ptr.vmem [resolvable:$true] %s560_s1  ;;  %s1218_s0 = int_to_ptr.vmem [resolvable:$true] %s569_s0 }
 0x1e6   :  { %s950_s24 = scalar_lea.vmem %s561_s1, 16  ;;  %s954_s11 = scalar_lea.vmem %s561_s1, 32 }
 0x1e7   :  { %v415_v30 = vpop.xlane.xlu0 %414  ;;  %v417_v31 = vpop.xlane.xlu1 %416  ;;  %p951_p12 = scmp.ne.s32.totalorder %s561_s1, %s950_s24  ;;  %p955_p13 = scmp.lt.s32.totalorder %s561_s1, %s561_s1 }
 0x1e8   :  { %437 = vst.msk [vmem:[#allocation13 + $0x50] sm:$0xff] %vm426_vm2, %v415_v30  ;;  %438 = vst.msk [vmem:[#allocation13 + $0x58] sm:$0xff] %vm426_vm2, %v417_v31  ;;  %p956_p0 = scmp.lt.s32.totalorder %s954_s11, %s950_s24 }
 0x1ea   :  { %p957_p1 = por %p956_p0, %p955_p13 }
 0x1eb   :  { %v411_v32 = vpop.xlane.xlu0 %410  ;;  %v413_v33 = vpop.xlane.xlu1 %412 }
 0x1ec   :  { %435 = vst.msk [vmem:[#allocation13 + $0x40] sm:$0xff] %vm426_vm2, %v411_v32  ;;  %436 = vst.msk [vmem:[#allocation13 + $0x48] sm:$0xff] %vm426_vm2, %v413_v33  ;;  %p958_p2 = pnand %p957_p1, %p951_p12 }
 0x1ef   :  { %v419_v34 = vpop.xlane.xlu0 %418  ;;  %v421_v35 = vpop.xlane.xlu1 %420 }
 0x1f0   :  { %439 = vst.msk [vmem:[#allocation13 + $0x60] sm:$0xff] %vm426_vm2, %v419_v34  ;;  %440 = vst.msk [vmem:[#allocation13 + $0x68] sm:$0xff] %vm426_vm2, %v421_v35 }
 0x1f3   :  { %v423_v36 = vpop.xlane.xlu0 %422  ;;  %v425_v37 = vpop.xlane.xlu1 %424 }
 0x1f4   :  { %441 = vst.msk [vmem:[#allocation13 + $0x70] sm:$0xff] %vm426_vm2, %v423_v36  ;;  %442 = vst.msk [vmem:[#allocation13 + $0x78] sm:$0xff] %vm426_vm2, %v425_v37 }
 0x258   :  { %v366_v38 = vpop.f32.mrb[0].mxu1 }
 0x259   :  { %370 = vst [vmem:[#allocation11] sm:$0x1] %v366_v38  ;;  %v785_v39 = vpop.f32.mrb[1].mxu1 }
 0x25a   :  { %961 = shalt.err (!%p958_p2)
}
 0x25b   :  { %s962_s14 = scalar_lea.hbm %s1254_s5, 16 }
 0x25c   :  { %p963_p3 = scmp.ne.s32.totalorder %s1254_s5, %s962_s14  ;;  %p966_p4 = scmp.lt.u32.totalorder %s962_s14, %s1254_s5 }
 0x25e   :  { %p968_p5 = pnand %p966_p4, %p963_p3 }
 0x260   :  { %971 = shalt.err (!%p968_p5)
}
 0x261   :  { %563 = dma.vmem_to_hbm [thread:$0]  %s561_s1, 16, %s1254_s5, [#allocation12]  }
 0x262   :  { %s972_s2 = scalar_lea.vmem %s1218_s0, 2048  ;;  %p977_p7 = scmp.lt.s32.totalorder %s1218_s0, %s1218_s0 }
 0x263   :  { %p973_p6 = scmp.ne.s32.totalorder %s1218_s0, %s972_s2  ;;  %p978_p8 = scmp.lt.s32.totalorder %s972_s2, %s972_s2 }
 0x265   :  { %p979_p9 = por %p978_p8, %p977_p7 }
 0x267   :  { %p980_p10 = pnand %p979_p9, %p973_p6 }
 0x269   :  { %983 = shalt.err (!%p980_p10)
}
 0x26a   :  { %s984_s23 = scalar_lea.hbm %s1255_s6, 2048 }
 0x26b   :  { %p985_p11 = scmp.ne.s32.totalorder %s1255_s6, %s984_s23  ;;  %p988_p12 = scmp.lt.u32.totalorder %s984_s23, %s1255_s6 }
 0x26d   :  { %p990_p13 = pnand %p988_p12, %p985_p11 }
 0x26f   :  { %993 = shalt.err (!%p990_p13)
}
 0x270   :  { %s1016_s5 = smov 128   ;;  %s1017_s29 = smov 8  }
 0x271   :  { %575 = dma.vmem_to_hbm [thread:$0]  %s1218_s0, 2048, %s1255_s6, [#allocation12], %s1016_s5, %s1016_s5, %s1017_s29  }
 0x272   :  { %1000 = dma.done.wait [#allocation4], 1024  }
 0x273   :  { %1001 = vsyncadd [#allocation4], 4294966272 }
 0x274   :  { %1002 = dma.done.wait [#allocation12], 2064  }
 0x275   :  { %1003 = vsyncadd [#allocation12], 4294965232 }
 0x276   :  { %585 = vsyncpa [#allocation3], 1 }
 0x277   :  { %586 = vsyncpa [#allocation6], 1 }
 0x278   :  { %587 = vsyncpa [#allocation9], 1 }
 0x279   :  { %588 = vsyncpa [#allocation4], 1 }
 0x27a   :  { %589 = vsyncpa [#allocation12], 1 }

// kernel: tpu_custom_call.1
= control target key start
LH: loop header
LB: loop body
LE: loop exit
PB: predicated region body
PF: predicated region fallthrough
CT: control target
= control target key end

     0   :  { %12 = vsyncpa [#allocation3], 0  ;;  %s1249_s0 = inlined_call_operand.hbm [shape: bf16[128,128], index: 0, kind: input, shape index: {}]   ;;  %s1250_s1 = inlined_call_operand.hbm [shape: f32[1,128], index: 1, kind: input, shape index: {}]   ;;  %s1251_s2 = inlined_call_operand.hbm [shape: f32[1,128], index: 2, kind: input, shape index: {}]   ;;  %s1252_s3 = inlined_call_operand.hbm [shape: bf16[128,128], index: 3, kind: input, shape index: {}]   ;;  %s1253_s4 = inlined_call_operand.hbm [shape: bf16[128,128], index: 4, kind: output, shape index: {0}]   ;;  %s1254_s5 = inlined_call_operand.hbm [shape: f32[1,128], index: 5, kind: output, shape index: {1}]   ;;  %s1255_s6 = inlined_call_operand.hbm [shape: f32[128,1], index: 6, kind: output, shape index: {2}]  }
   0x1   :  { %13 = vsyncpa [#allocation6], 0 }
   0x2   :  { %14 = vsyncpa [#allocation9], 0 }
   0x3   :  { %15 = vsyncpa [#allocation4], 0 }
   0x4   :  { %16 = vsyncpa [#allocation12], 0  ;;  %s1004_s21 = smov [#allocation5]   ;;  %s1005_s23 = smov [#allocation2]  }
   0x5   :  { %s35_s22 = sshll.u32 %s1004_s21, 4  ;;  %s22_s24 = sshll.u32 %s1005_s23, 4  ;;  %s36_s22 = int_to_ptr.vmem [resolvable:$true] %s35_s22  ;;  %s1053_s24 = int_to_ptr.vmem [resolvable:$true] %s22_s24 }
   0x6   :  { %s840_s27 = scalar_lea.hbm %s1250_s1, 16 }
   0x7   :  { %p841_p0 = scmp.ne.s32.totalorder %s1250_s1, %s840_s27  ;;  %p844_p1 = scmp.lt.u32.totalorder %s840_s27, %s1250_s1 }
   0x9   :  { %p846_p2 = pnand %p844_p1, %p841_p0 }
   0xb   :  { %849 = shalt.err (!%p846_p2)
}
   0xc   :  { %s850_s8 = scalar_lea.vmem %s36_s22, 16  ;;  %s854_s9 = scalar_lea.vmem %s36_s22, 32 }
   0xd   :  { %p851_p3 = scmp.ne.s32.totalorder %s36_s22, %s850_s8  ;;  %p855_p4 = scmp.lt.s32.totalorder %s36_s22, %s36_s22 }
   0xe   :  { %p856_p5 = scmp.lt.s32.totalorder %s854_s9, %s850_s8 }
  0x10   :  { %p857_p6 = por %p856_p5, %p855_p4 }
  0x12   :  { %p858_p7 = pnand %p857_p6, %p851_p3 }
  0x14   :  { %861 = shalt.err (!%p858_p7)
}
  0x15   :  { %38 = dma.hbm_to_vmem [thread:$0]  %s1250_s1, 16, %s36_s22, [#allocation6]  }
  0x16   :  { %s862_s14 = scalar_lea.hbm %s1249_s0, 1024 }
  0x17   :  { %p863_p8 = scmp.ne.s32.totalorder %s1249_s0, %s862_s14  ;;  %p866_p9 = scmp.lt.u32.totalorder %s862_s14, %s1249_s0 }
  0x19   :  { %p868_p10 = pnand %p866_p9, %p863_p8 }
  0x1b   :  { %871 = shalt.err (!%p868_p10)
}
  0x1c   :  { %s872_s19 = scalar_lea.vmem %s1053_s24, 1024  ;;  %p877_p12 = scmp.lt.s32.totalorder %s1053_s24, %s1053_s24 }
  0x1d   :  { %p873_p11 = scmp.ne.s32.totalorder %s1053_s24, %s872_s19  ;;  %p878_p13 = scmp.lt.s32.totalorder %s872_s19, %s872_s19 }
  0x1f   :  { %p879_p0 = por %p878_p13, %p877_p12 }
  0x21   :  { %p880_p1 = pnand %p879_p0, %p873_p11 }
  0x23   :  { %883 = shalt.err (!%p880_p1)
}
  0x24   :  { %s1006_s1 = smov 64   ;;  %s1007_s20 = smov 4  }
  0x25   :  { %28 = dma.hbm_to_vmem [thread:$0]  %s1249_s0, 1024, %s1053_s24, [#allocation3], %s1006_s1, %s1006_s1, %s1007_s20  }
  0x26   :  { %s1008_s23 = smov [#allocation7]   ;;  %s1009_s26 = smov [#allocation8]  }
  0x27   :  { %s45_s25 = sshll.u32 %s1008_s23, 4  ;;  %s54_s27 = sshll.u32 %s1009_s26, 4  ;;  %s46_s25 = int_to_ptr.vmem [resolvable:$true] %s45_s25  ;;  %s1087_s27 = int_to_ptr.vmem [resolvable:$true] %s54_s27 }
  0x28   :  { %s884_s30 = scalar_lea.hbm %s1251_s2, 16 }
  0x29   :  { %p885_p2 = scmp.ne.s32.totalorder %s1251_s2, %s884_s30  ;;  %p888_p3 = scmp.lt.u32.totalorder %s884_s30, %s1251_s2 }
  0x2b   :  { %p890_p4 = pnand %p888_p3, %p885_p2 }
  0x2d   :  { %893 = shalt.err (!%p890_p4)
}
  0x2e   :  { %s894_s0 = scalar_lea.vmem %s46_s25, 16  ;;  %s898_s24 = scalar_lea.vmem %s46_s25, 32 }
  0x2f   :  { %p895_p5 = scmp.ne.s32.totalorder %s46_s25, %s894_s0  ;;  %p899_p6 = scmp.lt.s32.totalorder %s46_s25, %s46_s25 }
  0x30   :  { %p900_p7 = scmp.lt.s32.totalorder %s898_s24, %s894_s0 }
  0x32   :  { %p901_p8 = por %p900_p7, %p899_p6 }
  0x34   :  { %p902_p9 = pnand %p901_p8, %p895_p5 }
  0x36   :  { %905 = shalt.err (!%p902_p9)
}
  0x37   :  { %48 = dma.hbm_to_vmem [thread:$0]  %s1251_s2, 16, %s46_s25, [#allocation6]  }
  0x38   :  { %s906_s15 = scalar_lea.hbm %s1252_s3, 1024 }
  0x39   :  { %p907_p10 = scmp.ne.s32.totalorder %s1252_s3, %s906_s15  ;;  %p910_p11 = scmp.lt.u32.totalorder %s906_s15, %s1252_s3 }
  0x3b   :  { %p912_p12 = pnand %p910_p11, %p907_p10 }
  0x3d   :  { %915 = shalt.err (!%p912_p12)
}
  0x3e   :  { %s916_s21 = scalar_lea.vmem %s1087_s27, 1024  ;;  %p921_p0 = scmp.lt.s32.totalorder %s1087_s27, %s1087_s27 }
  0x3f   :  { %p917_p13 = scmp.ne.s32.totalorder %s1087_s27, %s916_s21  ;;  %p922_p1 = scmp.lt.s32.totalorder %s916_s21, %s916_s21 }
  0x41   :  { %p923_p2 = por %p922_p1, %p921_p0 }
  0x43   :  { %p924_p3 = pnand %p923_p2, %p917_p13 }
  0x45   :  { %927 = shalt.err (!%p924_p3)
}
  0x46   :  { %60 = dma.hbm_to_vmem [thread:$0]  %s1252_s3, 1024, %s1087_s27, [#allocation9], %s1006_s1, %s1006_s1, %s1007_s20  }
  0x47   :  { %994 = dma.done.wait [#allocation3], 1024  }
  0x48   :  { %995 = vsyncadd [#allocation3], 4294966272 }
  0x49   :  { %996 = dma.done.wait [#allocation6], 32  }
  0x4a   :  { %997 = vsyncadd [#allocation6], 4294967264 }
  0x4b   :  { %998 = dma.done.wait [#allocation9], 1024  }
  0x4c   :  { %999 = vsyncadd [#allocation9], 4294966272  ;;  %v824_v0 = vld [vmem:[#allocation8] sm:$0xff]   ;;  %v825_v1 = vld [vmem:[#allocation8 + $0x8] sm:$0xff]   ;;  %v1010_v16 = vmov 0.0|0.0   ;;  %vm1011_vm0 = vmmov 0   ;;  %v443_v18 = vlaneseq }
  0x4d   :  { %719 = vmatprep.subr.bf16.mxu0 %v824_v0  ;;  %v826_v2 = vld [vmem:[#allocation8 + $0x10] sm:$0xff]   ;;  %v827_v3 = vld [vmem:[#allocation8 + $0x18] sm:$0xff]   ;;  %v828_v5 = vld [vmem:[#allocation8 + $0x20] sm:$0xff]   ;;  %786 = vmatprep.subr.bf16.mxu1 %v1010_v16  ;;  %v1012_v17 = vmov 0.0   ;;  %vm426_vm2 = vcmask 7168   ;;  %s1013_s3 = smov [#allocation10]  }
  0x4e   :  { %720 = vmatpush3.bf16.msra.mxu0 %v824_v0  ;;  %v832_v4 = vld [vmem:[#allocation2] sm:$0xff]   ;;  %v829_v6 = vld [vmem:[#allocation8 + $0x28] sm:$0xff]   ;;  %v830_v7 = vld [vmem:[#allocation8 + $0x30] sm:$0xff]   ;;  %783 = vmatprep.mubr.msk.f32.mxu1 %vm1011_vm0, %v1012_v17  ;;  %v1122_v19 = vand.u32 127, %v443_v18  ;;  %s547_s23 = sshll.u32 %s1013_s3, 4  ;;  %s548_s23 = int_to_ptr.vmem [resolvable:$true] %s547_s23 }
  0x4f   :  { %721 = vmatprep.subr.bf16.mxu0 %v825_v1  ;;  %735 = vmatprep.mubr.bf16.mxu0 %v832_v4  ;;  %v831_v8 = vld [vmem:[#allocation8 + $0x38] sm:$0xff]   ;;  %v833_v9 = vld [vmem:[#allocation2 + $0x8] sm:$0xff]   ;;  %v834_v10 = vld [vmem:[#allocation2 + $0x10] sm:$0xff]   ;;  %s928_s25 = scalar_lea.vmem %s548_s23, 1024  ;;  %p933_p5 = scmp.lt.s32.totalorder %s548_s23, %s548_s23 }
  0x50   :  { %v835_v11 = vld [vmem:[#allocation2 + $0x18] sm:$0xff]   ;;  %v836_v12 = vld [vmem:[#allocation2 + $0x20] sm:$0xff]   ;;  %v837_v13 = vld [vmem:[#allocation2 + $0x28] sm:$0xff]   ;;  %vm445_vm1 = vcmp.eq.s32.totalorder %v1122_v19, 32  ;;  %p929_p4 = scmp.ne.s32.totalorder %s548_s23, %s928_s25  ;;  %p934_p6 = scmp.lt.s32.totalorder %s928_s25, %s928_s25 }
  0x51   :  { %v838_v14 = vld [vmem:[#allocation2 + $0x30] sm:$0xff]   ;;  %v839_v15 = vld [vmem:[#allocation2 + $0x38] sm:$0xff]   ;;  %v1124_v20 = vld [vmem:[#allocation7] ss:$0 sm:$0xff] }
  0x52   :  { %722 = vmatpush3.bf16.msra.mxu0 %v825_v1  ;;  %v299_v19 = vld [vmem:[#allocation5] sm:$0x1]  ;;  %p935_p7 = por %p934_p6, %p933_p5 }
  0x53   :  { %723 = vmatprep.subr.bf16.mxu0 %v826_v2 }
  0x54   :  { %p936_p8 = pnand %p935_p7, %p929_p4 }
  0x56   :  { %724 = vmatpush3.bf16.msra.mxu0 %v826_v2 }
  0x57   :  { %725 = vmatprep.subr.bf16.mxu0 %v827_v3 }
  0x5a   :  { %726 = vmatpush3.bf16.msra.mxu0 %v827_v3 }
  0x5b   :  { %727 = vmatprep.subr.bf16.mxu0 %v828_v5 }
  0x5e   :  { %728 = vmatpush3.bf16.msra.mxu0 %v828_v5 }
  0x5f   :  { %729 = vmatprep.subr.bf16.mxu0 %v829_v6 }
  0x62   :  { %730 = vmatpush3.bf16.msra.mxu0 %v829_v6 }
  0x63   :  { %731 = vmatprep.subr.bf16.mxu0 %v830_v7 }
  0x66   :  { %732 = vmatpush3.bf16.msra.mxu0 %v830_v7 }
  0x67   :  { %733 = vmatprep.subr.bf16.mxu0 %v831_v8 }
  0x6a   :  { %734 = vmatpush3.bf16.msra.mxu0 %v831_v8 }
  0x6d   :  { %736 = vmatmul.mubr.bf16.vlgmr.msra.gmra.mrb[0].mxu0 %v833_v9 }
  0x6e   :  { %739 = vmatprep.mubr.bf16.mxu0 %v834_v10 }
  0x75   :  { %740 = vmatmul.mubr.bf16.gmra.mrb[4].mxu0 %v835_v11 }
  0x76   :  { %743 = vmatprep.mubr.bf16.mxu0 %v836_v12 }
  0x7d   :  { %744 = vmatmul.mubr.bf16.gmra.mrb[8].mxu0 %v837_v13 }
  0x7e   :  { %747 = vmatprep.mubr.bf16.mxu0 %v838_v14 }
  0x85   :  { %748 = vmatmul.mubr.bf16.gmra.mrb[12].mxu0 %v839_v15 }
 0x140   :  { %v737_v21 = vpop.f32.mrb[0].mxu0 }
 0x141   :  { %v236_v22 = vpop.f32.mrb[1].mxu0  ;;  %v380_v23 = vmul.f32 %v737_v21, %v1124_v20  ;;  %v448_v26 = vsel %vm445_vm1, 1.0, %v737_v21 }
 0x142   :  { %v738_v24 = vpop.f32.mrb[2].mxu0  ;;  %v378_v25 = vmul.f32 %v1124_v20, %v236_v22  ;;  %v446_v30 = vsel %vm445_vm1, 1.0, %v236_v22 }
 0x143   :  { %v790_v27 = vpack.c.bf16 %v738_v24, %v737_v21  ;;  %v449_v28 = vsel %vm445_vm1, 1.0, %v738_v24  ;;  %398 = vadd.xlane.f32.xlu1 %v380_v23  ;;  %v239_v29 = vpop.f32.mrb[3].mxu0  ;;  %v381_v35 = vmul.f32 %v738_v24, %v1124_v20 }
 0x144   :  { %v647_v31 = vpack.c.bf16 %v449_v28, %v448_v26  ;;  %v447_v32 = vsel %vm445_vm1, 1.0, %v239_v29  ;;  %394 = vadd.xlane.f32.xlu0 %v378_v25  ;;  %v787_v33 = vpack.c.bf16 %v239_v29, %v236_v22  ;;  %v379_v36 = vmul.f32 %v1124_v20, %v239_v29 }
 0x145   :  { %v642_v34 = vpack.c.bf16 %v447_v32, %v446_v30 }
 0x146   :  { %679 = vst [vmem:[#allocation10 + $0x8] sm:$0xff] %v647_v31   ;;  %788 = vmatpush3.bf16.xpose.msra.mxu1 %v787_v33 }
 0x147   :  { %643 = vst [vmem:[#allocation10] sm:$0xff] %v642_v34   ;;  %400 = vadd.xlane.f32.xlu1 %v381_v35  ;;  %789 = vmatprep.subr.bf16.mxu1 %v1010_v16 }
 0x148   :  { %396 = vadd.xlane.f32.xlu0 %v379_v36  ;;  %v1140_v37 = vpop.f32.mrb[4].mxu0 }
 0x149   :  { %v452_v38 = vsel %vm445_vm1, 1.0, %v1140_v37  ;;  %v252_v39 = vpop.f32.mrb[5].mxu0  ;;  %v384_v40 = vmul.f32 %v1140_v37, %v1124_v20 }
 0x14a   :  { %v450_v41 = vsel %vm445_vm1, 1.0, %v252_v39  ;;  %v742_v42 = vpop.f32.mrb[6].mxu0  ;;  %v382_v50 = vmul.f32 %v1124_v20, %v252_v39 }
 0x14b   :  { %v796_v43 = vpack.c.bf16 %v742_v42, %v1140_v37  ;;  %v453_v44 = vsel %vm445_vm1, 1.0, %v742_v42  ;;  %v385_v45 = vmul.f32 %v742_v42, %v1124_v20  ;;  %v255_v46 = vpop.f32.mrb[7].mxu0 }
 0x14c   :  { %v657_v47 = vpack.c.bf16 %v453_v44, %v452_v38  ;;  %406 = vadd.xlane.f32.xlu0 %v384_v40  ;;  %v793_v48 = vpack.c.bf16 %v255_v46, %v252_v39  ;;  %v451_v49 = vsel %vm445_vm1, 1.0, %v255_v46  ;;  %v383_v52 = vmul.f32 %v1124_v20, %v255_v46 }
 0x14d   :  { %408 = vadd.xlane.f32.xlu1 %v385_v45  ;;  %v652_v51 = vpack.c.bf16 %v451_v49, %v450_v41 }
 0x14e   :  { %681 = vst [vmem:[#allocation10 + $0x18] sm:$0xff] %v657_v47   ;;  %791 = vmatpush3.bf16.xpose.msra.mxu1 %v790_v27 }
 0x14f   :  { %680 = vst [vmem:[#allocation10 + $0x10] sm:$0xff] %v652_v51   ;;  %792 = vmatprep.subr.bf16.mxu1 %v1010_v16 }
 0x150   :  { %402 = vadd.xlane.f32.xlu0 %v382_v50  ;;  %v745_v53 = vpop.f32.mrb[8].mxu0 }
 0x151   :  { %404 = vadd.xlane.f32.xlu1 %v383_v52  ;;  %v456_v54 = vsel %vm445_vm1, 1.0, %v745_v53  ;;  %v268_v55 = vpop.f32.mrb[9].mxu0  ;;  %v388_v56 = vmul.f32 %v745_v53, %v1124_v20 }
 0x152   :  { %v454_v57 = vsel %vm445_vm1, 1.0, %v268_v55  ;;  %v746_v58 = vpop.f32.mrb[10].mxu0  ;;  %v386_v2 = vmul.f32 %v1124_v20, %v268_v55 }
 0x153   :  { %v802_v59 = vpack.c.bf16 %v746_v58, %v745_v53  ;;  %v457_v60 = vsel %vm445_vm1, 1.0, %v746_v58  ;;  %v389_v61 = vmul.f32 %v746_v58, %v1124_v20  ;;  %v271_v62 = vpop.f32.mrb[11].mxu0 }
 0x154   :  { %v667_v63 = vpack.c.bf16 %v457_v60, %v456_v54  ;;  %414 = vadd.xlane.f32.xlu0 %v388_v56  ;;  %v799_v0 = vpack.c.bf16 %v271_v62, %v268_v55  ;;  %v455_v1 = vsel %vm445_vm1, 1.0, %v271_v62  ;;  %v387_v4 = vmul.f32 %v1124_v20, %v271_v62 }
 0x155   :  { %416 = vadd.xlane.f32.xlu1 %v389_v61  ;;  %v662_v3 = vpack.c.bf16 %v455_v1, %v454_v57 }
 0x156   :  { %794 = vmatpush3.bf16.xpose.msra.mxu1 %v793_v48  ;;  %683 = vst [vmem:[#allocation10 + $0x28] sm:$0xff] %v667_v63  }
 0x157   :  { %795 = vmatprep.subr.bf16.mxu1 %v1010_v16  ;;  %682 = vst [vmem:[#allocation10 + $0x20] sm:$0xff] %v662_v3  }
 0x158   :  { %410 = vadd.xlane.f32.xlu0 %v386_v2  ;;  %v749_v5 = vpop.f32.mrb[12].mxu0 }
 0x159   :  { %412 = vadd.xlane.f32.xlu1 %v387_v4  ;;  %v460_v6 = vsel %vm445_vm1, 1.0, %v749_v5  ;;  %v284_v7 = vpop.f32.mrb[13].mxu0  ;;  %v392_v14 = vmul.f32 %v749_v5, %v1124_v20 }
 0x15a   :  { %v458_v8 = vsel %vm445_vm1, 1.0, %v284_v7  ;;  %v750_v9 = vpop.f32.mrb[14].mxu0  ;;  %v390_v10 = vmul.f32 %v1124_v20, %v284_v7 }
 0x15b   :  { %v808_v11 = vpack.c.bf16 %v750_v9, %v749_v5  ;;  %v461_v12 = vsel %vm445_vm1, 1.0, %v750_v9  ;;  %v287_v13 = vpop.f32.mrb[15].mxu0  ;;  %v393_v23 = vmul.f32 %v750_v9, %v1124_v20 }
 0x15c   :  { %v677_v15 = vpack.c.bf16 %v461_v12, %v460_v6  ;;  %v805_v17 = vpack.c.bf16 %v287_v13, %v284_v7  ;;  %v459_v18 = vsel %vm445_vm1, 1.0, %v287_v13  ;;  %418 = vadd.xlane.f32.xlu0 %v390_v10  ;;  %v391_v21 = vmul.f32 %v1124_v20, %v287_v13 }
 0x15d   :  { %v672_v22 = vpack.c.bf16 %v459_v18, %v458_v8 }
 0x15e   :  { %797 = vmatpush3.bf16.xpose.msra.mxu1 %v796_v43  ;;  %685 = vst [vmem:[#allocation10 + $0x38] sm:$0xff] %v677_v15   ;;  %420 = vadd.xlane.f32.xlu1 %v391_v21 }
 0x15f   :  { %798 = vmatprep.subr.bf16.mxu1 %v1010_v16  ;;  %684 = vst [vmem:[#allocation10 + $0x30] sm:$0xff] %v672_v22  }
 0x160   :  { %422 = vadd.xlane.f32.xlu0 %v392_v14 }
 0x162   :  { %424 = vadd.xlane.f32.xlu1 %v393_v23 }
 0x166   :  { %800 = vmatpush3.bf16.xpose.msra.mxu1 %v799_v0 }
 0x167   :  { %801 = vmatprep.subr.bf16.mxu1 %v1010_v16 }
 0x16e   :  { %803 = vmatpush3.bf16.xpose.msra.mxu1 %v802_v59 }
 0x16f   :  { %804 = vmatprep.subr.bf16.mxu1 %v1010_v16 }
 0x176   :  { %806 = vmatpush3.bf16.xpose.msra.mxu1 %v805_v17 }
 0x177   :  { %807 = vmatprep.subr.bf16.mxu1 %v1010_v16 }
 0x17e   :  { %809 = vmatpush3.bf16.xpose.msra.mxu1 %v808_v11 }
 0x185   :  { %784 = vmatmul.mubr.f32.vlgmr.msra.gmra.mrb[0].mxu1 %v299_v19 }
 0x1d0   :  { %v399_v24 = vpop.xlane.xlu1 %398 }
 0x1d1   :  { %429 = vst.msk [vmem:[#allocation13 + $0x10] sm:$0xff] %vm426_vm2, %v399_v24  ;;  %v395_v20 = vpop.xlane.xlu0 %394 }
 0x1d2   :  { %427 = vst.msk [vmem:[#allocation13] sm:$0xff] %vm426_vm2, %v395_v20 }
 0x1d4   :  { %v401_v25 = vpop.xlane.xlu1 %400 }
 0x1d5   :  { %430 = vst.msk [vmem:[#allocation13 + $0x18] sm:$0xff] %vm426_vm2, %v401_v25  ;;  %v397_v26 = vpop.xlane.xlu0 %396 }
 0x1d6   :  { %428 = vst.msk [vmem:[#allocation13 + $0x8] sm:$0xff] %vm426_vm2, %v397_v26 }
 0x1d9   :  { %v407_v27 = vpop.xlane.xlu0 %406 }
 0x1da   :  { %433 = vst.msk [vmem:[#allocation13 + $0x30] sm:$0xff] %vm426_vm2, %v407_v27  ;;  %v409_v16 = vpop.xlane.xlu1 %408 }
 0x1db   :  { %434 = vst.msk [vmem:[#allocation13 + $0x38] sm:$0xff] %vm426_vm2, %v409_v16 }
 0x1dc   :  { %939 = shalt.err (!%p936_p8)
}
 0x1dd   :  { %s940_s28 = scalar_lea.hbm %s1253_s4, 1024 }
 0x1de   :  { %p941_p9 = scmp.ne.s32.totalorder %s1253_s4, %s940_s28  ;;  %p944_p10 = scmp.lt.u32.totalorder %s940_s28, %s1253_s4 }
 0x1e0   :  { %p946_p11 = pnand %p944_p10, %p941_p9 }
 0x1e2   :  { %949 = shalt.err (!%p946_p11)
}
 0x1e3   :  { %553 = dma.vmem_to_hbm [thread:$0]  %s548_s23, 1024, %s1253_s4, [#allocation4], %s1006_s1, %s1006_s1, %s1007_s20   ;;  %v403_v28 = vpop.xlane.xlu0 %402  ;;  %v405_v29 = vpop.xlane.xlu1 %404 }
 0x1e4   :  { %431 = vst.msk [vmem:[#allocation13 + $0x20] sm:$0xff] %vm426_vm2, %v403_v28  ;;  %432 = vst.msk [vmem:[#allocation13 + $0x28] sm:$0xff] %vm426_vm2, %v405_v29  ;;  %s1014_s4 = smov [#allocation11]   ;;  %s1015_s20 = smov [#allocation13]  }
 0x1e5   :  { %s560_s1 = sshll.u32 %s1014_s4, 4  ;;  %s569_s0 = sshll.u32 %s1015_s20, 4  ;;  %s561_s1 = int_to_ptr.vmem [resolvable:$true] %s560_s1  ;;  %s1218_s0 = int_to_ptr.vmem [resolvable:$true] %s569_s0 }
 0x1e6   :  { %s950_s24 = scalar_lea.vmem %s561_s1, 16  ;;  %s954_s11 = scalar_lea.vmem %s561_s1, 32 }
 0x1e7   :  { %v415_v30 = vpop.xlane.xlu0 %414  ;;  %v417_v31 = vpop.xlane.xlu1 %416  ;;  %p951_p12 = scmp.ne.s32.totalorder %s561_s1, %s950_s24  ;;  %p955_p13 = scmp.lt.s32.totalorder %s561_s1, %s561_s1 }
 0x1e8   :  { %437 = vst.msk [vmem:[#allocation13 + $0x50] sm:$0xff] %vm426_vm2, %v415_v30  ;;  %438 = vst.msk [vmem:[#allocation13 + $0x58] sm:$0xff] %vm426_vm2, %v417_v31  ;;  %p956_p0 = scmp.lt.s32.totalorder %s954_s11, %s950_s24 }
 0x1ea   :  { %p957_p1 = por %p956_p0, %p955_p13 }
 0x1eb   :  { %v411_v32 = vpop.xlane.xlu0 %410  ;;  %v413_v33 = vpop.xlane.xlu1 %412 }
 0x1ec   :  { %435 = vst.msk [vmem:[#allocation13 + $0x40] sm:$0xff] %vm426_vm2, %v411_v32  ;;  %436 = vst.msk [vmem:[#allocation13 + $0x48] sm:$0xff] %vm426_vm2, %v413_v33  ;;  %p958_p2 = pnand %p957_p1, %p951_p12 }
 0x1ef   :  { %v419_v34 = vpop.xlane.xlu0 %418  ;;  %v421_v35 = vpop.xlane.xlu1 %420 }
 0x1f0   :  { %439 = vst.msk [vmem:[#allocation13 + $0x60] sm:$0xff] %vm426_vm2, %v419_v34  ;;  %440 = vst.msk [vmem:[#allocation13 + $0x68] sm:$0xff] %vm426_vm2, %v421_v35 }
 0x1f3   :  { %v423_v36 = vpop.xlane.xlu0 %422  ;;  %v425_v37 = vpop.xlane.xlu1 %424 }
 0x1f4   :  { %441 = vst.msk [vmem:[#allocation13 + $0x70] sm:$0xff] %vm426_vm2, %v423_v36  ;;  %442 = vst.msk [vmem:[#allocation13 + $0x78] sm:$0xff] %vm426_vm2, %v425_v37 }
 0x258   :  { %v366_v38 = vpop.f32.mrb[0].mxu1 }
 0x259   :  { %370 = vst [vmem:[#allocation11] sm:$0x1] %v366_v38  ;;  %v785_v39 = vpop.f32.mrb[1].mxu1 }
 0x25a   :  { %961 = shalt.err (!%p958_p2)
}
 0x25b   :  { %s962_s14 = scalar_lea.hbm %s1254_s5, 16 }
 0x25c   :  { %p963_p3 = scmp.ne.s32.totalorder %s1254_s5, %s962_s14  ;;  %p966_p4 = scmp.lt.u32.totalorder %s962_s14, %s1254_s5 }
 0x25e   :  { %p968_p5 = pnand %p966_p4, %p963_p3 }
 0x260   :  { %971 = shalt.err (!%p968_p5)
}
 0x261   :  { %563 = dma.vmem_to_hbm [thread:$0]  %s561_s1, 16, %s1254_s5, [#allocation12]  }
 0x262   :  { %s972_s2 = scalar_lea.vmem %s1218_s0, 2048  ;;  %p977_p7 = scmp.lt.s32.totalorder %s1218_s0, %s1218_s0 }
 0x263   :  { %p973_p6 = scmp.ne.s32.totalorder %s1218_s0, %s972_s2  ;;  %p978_p8 = scmp.lt.s32.totalorder %s972_s2, %s972_s2 }
 0x265   :  { %p979_p9 = por %p978_p8, %p977_p7 }
 0x267   :  { %p980_p10 = pnand %p979_p9, %p973_p6 }
 0x269   :  { %983 = shalt.err (!%p980_p10)
}
 0x26a   :  { %s984_s23 = scalar_lea.hbm %s1255_s6, 2048 }
 0x26b   :  { %p985_p11 = scmp.ne.s32.totalorder %s1255_s6, %s984_s23  ;;  %p988_p12 = scmp.lt.u32.totalorder %s984_s23, %s1255_s6 }
 0x26d   :  { %p990_p13 = pnand %p988_p12, %p985_p11 }
 0x26f   :  { %993 = shalt.err (!%p990_p13)
}
 0x270   :  { %s1016_s5 = smov 128   ;;  %s1017_s29 = smov 8  }
 0x271   :  { %575 = dma.vmem_to_hbm [thread:$0]  %s1218_s0, 2048, %s1255_s6, [#allocation12], %s1016_s5, %s1016_s5, %s1017_s29  }
 0x272   :  { %1000 = dma.done.wait [#allocation4], 1024  }
 0x273   :  { %1001 = vsyncadd [#allocation4], 4294966272 }
 0x274   :  { %1002 = dma.done.wait [#allocation12], 2064  }
 0x275   :  { %1003 = vsyncadd [#allocation12], 4294965232 }
 0x276   :  { %585 = vsyncpa [#allocation3], 1 }
 0x277   :  { %586 = vsyncpa [#allocation6], 1 }
 0x278   :  { %587 = vsyncpa [#allocation9], 1 }
 0x279   :  { %588 = vsyncpa [#allocation4], 1 }
 0x27a   :  { %589 = vsyncpa [#allocation12], 1 }

</bundles_post_ra>
